<compile_context>
chip_gen: v7x
topology: tpu7x:2x2x1
jax: 0.10.0
libtpu: 0.0.40
codegen_flags: <defaults>
</compile_context>

<pallas_src>
import jax
import jax.numpy as jnp
from jax.experimental import pallas as pl
from jax.experimental.pallas import tpu as pltpu

NUM_CLASSES = 3          # labels_map = ['Anshul', 'Harsh', 'Om']
EMB_DIM = 512
HIDDEN = 128
DROP_P = 0.5
OUT_PAD = 128            # lane-dense padded logits width (multiple of 128)


def facenet_kernel(f_ref, wf_ref, bf_ref, w1_ref, b1_ref,
                   w2_ref, b2_ref, mask_ref, out_ref):
    """One batch tile: stand-in embedding + exact CustomFaceNet classifier head."""
    # ---- synthetic frozen feature extractor (stand-in for InceptionResnetV1):
    # Linear(C, 512) on pooled features (bf16 MXU inputs, f32 accumulation),
    # then L2 normalization (classify=False returns F.normalize(x, p=2, dim=1)).
    e = jnp.dot(f_ref[...], wf_ref[...],
                preferred_element_type=jnp.float32) + bf_ref[...]
    ssq = jnp.sum(e * e, axis=-1, keepdims=True)
    # F.normalize eps=1e-12: x / max(||x||, eps) == x * rsqrt(max(ssq, eps^2))
    e = e * jax.lax.rsqrt(jnp.maximum(ssq, 1e-24))

    # ---- classifier head: Linear(512,128) -> ReLU -> Dropout(0.5) -> Linear(128,3)
    h = jnp.dot(e, w1_ref[...], preferred_element_type=jnp.float32) + b1_ref[...]
    h = jnp.maximum(h, 0.0)                       # ReLU
    # inverted dropout: mask already holds 0 or 1/(1-p) (all-ones in eval mode)
    h = h * mask_ref[...]

    # lane-dense (128-wide, zero-padded) logits; wrapper slices [:, :NUM_CLASSES]
    out_ref[...] = (jnp.dot(h, w2_ref[...], preferred_element_type=jnp.float32)
                    + b2_ref[...])


def _round_up(a, m):
    return (a + m - 1) // m * m


def custom_facenet(x, params, *, key=None, training=False):
    """x: (B, C, H, W) float32 NCHW image batch -> (B, NUM_CLASSES) logits."""
    wf, bf, w1, b1, w2, b2 = params
    B, C, H, W = x.shape

    # Global average pool outside the kernel: mem-bound, XLA fuses it, and it
    # shrinks the kernel's DMA/VMEM footprint by H*W x (key for v7x's 64 MiB VMEM).
    f = jnp.mean(x.astype(jnp.float32), axis=(2, 3))            # (B, C)

    # Pad batch (MXU M dim) to a sublane/MXU-friendly tile.
    B_pad = _round_up(B, 8)
    TB = min(128, B_pad)
    B_pad = _round_up(B_pad, TB)
    n_tiles = B_pad // TB
    f = jnp.pad(f, ((0, B_pad - B), (0, 0))).astype(jnp.bfloat16)

    # Dropout mask generated host-side (deterministic; no in-kernel PRNG, so it
    # runs identically on hardware and in interpret mode). Scale pre-folded.
    if training:
        if key is None:
            key = jax.random.PRNGKey(0)
        keep = jax.random.bernoulli(key, 1.0 - DROP_P, (B_pad, HIDDEN))
        mask = keep.astype(jnp.float32) * (1.0 / (1.0 - DROP_P))
    else:
        mask = jnp.ones((B_pad, HIDDEN), jnp.float32)

    # Pad the 3-class output path to a lane-dense 128-wide slab.
    w2p = jnp.pad(w2, ((0, 0), (0, OUT_PAD - NUM_CLASSES)))
    b2p = jnp.pad(b2, ((0, 0), (0, OUT_PAD - NUM_CLASSES)))
    wf_bf16 = wf.astype(jnp.bfloat16)

    def bcast(shape):   # weights/biases: resident, DMA'd once (block 0 always)
        return pl.BlockSpec(shape, lambda i: (0, 0))

    out = pl.pallas_call(
        facenet_kernel,
        out_shape=jax.ShapeDtypeStruct((B_pad, OUT_PAD), jnp.float32),
        grid=(n_tiles,),
        in_specs=[
            pl.BlockSpec((TB, C), lambda i: (i, 0)),            # pooled features
            bcast((C, EMB_DIM)),                                # wf  (bf16)
            bcast((1, EMB_DIM)),                                # bf
            bcast((EMB_DIM, HIDDEN)),                           # w1
            bcast((1, HIDDEN)),                                 # b1
            bcast((HIDDEN, OUT_PAD)),                           # w2 (lane-padded)
            bcast((1, OUT_PAD)),                                # b2 (lane-padded)
            pl.BlockSpec((TB, HIDDEN), lambda i: (i, 0)),       # dropout mask
        ],
        out_specs=pl.BlockSpec((TB, OUT_PAD), lambda i: (i, 0)),
        compiler_params=pltpu.CompilerParams(
            dimension_semantics=("parallel",)),
    )(f, wf_bf16, bf, w1, b1, w2p, b2p, mask)

    return out[:B, :NUM_CLASSES]


def init_params(key, in_channels):
    ks = jax.random.split(key, 6)
    wf = jax.random.normal(ks[0], (in_channels, EMB_DIM), jnp.float32) * 0.1
    bf = jax.random.normal(ks[1], (1, EMB_DIM), jnp.float32) * 0.01
    w1 = jax.random.normal(ks[2], (EMB_DIM, HIDDEN), jnp.float32) * (1.0 / EMB_DIM ** 0.5)
    b1 = jax.random.normal(ks[3], (1, HIDDEN), jnp.float32) * 0.01
    w2 = jax.random.normal(ks[4], (HIDDEN, NUM_CLASSES), jnp.float32) * (1.0 / HIDDEN ** 0.5)
    b2 = jax.random.normal(ks[5], (1, NUM_CLASSES), jnp.float32) * 0.01
    return wf, bf, w1, b1, w2, b2


if __name__ == "__main__":
    key = jax.random.PRNGKey(0)
    k_x, k_p, k_drop = jax.random.split(key, 3)

    B, C, H, W = 2, 4, 16, 16            # small synthetic image batch (NCHW)
    x = jax.random.normal(k_x, (B, C, H, W), jnp.float32)
    params = init_params(k_p, C)

    # training=True exercises the (deterministic, host-generated) dropout path.
    logits = custom_facenet(x, params, key=k_drop, training=True)
    jax.block_until_ready(logits)
    assert logits.shape == (B, NUM_CLASSES)
    assert bool(jnp.all(jnp.isfinite(logits)))
    print("KERNEL_OK")
</pallas_src>

<mosaic_0001>
module attributes {stable_mosaic.version = 11 : i64} {
  func.func @facenet_kernel(%arg0: i32, %arg1: memref<8x4xbf16, #tpu.memory_space<vmem>>, %arg2: memref<4x512xbf16, #tpu.memory_space<vmem>>, %arg3: memref<1x512xf32, #tpu.memory_space<vmem>>, %arg4: memref<512x128xf32, #tpu.memory_space<vmem>>, %arg5: memref<1x128xf32, #tpu.memory_space<vmem>>, %arg6: memref<128x128xf32, #tpu.memory_space<vmem>>, %arg7: memref<1x128xf32, #tpu.memory_space<vmem>>, %arg8: memref<8x128xf32, #tpu.memory_space<vmem>>, %arg9: memref<8x128xf32, #tpu.memory_space<vmem>>) attributes {dimension_semantics = [#tpu.dimension_semantics<parallel>], iteration_bounds = array<i64: 1>, scalar_prefetch = 0 : i64, scratch_operands = 0 : i64, tpu.core_type = #tpu.core_type<tc>, window_params = [{transform_indices = @transform_0, window_bounds = array<i64: 8, 4>}, {pipeline_mode = #tpu.pipeline_mode<synchronous>, transform_indices = @transform_1, window_bounds = array<i64: 4, 512>}, {pipeline_mode = #tpu.pipeline_mode<synchronous>, transform_indices = @transform_2, window_bounds = array<i64: 1, 512>}, {pipeline_mode = #tpu.pipeline_mode<synchronous>, transform_indices = @transform_3, window_bounds = array<i64: 512, 128>}, {pipeline_mode = #tpu.pipeline_mode<synchronous>, transform_indices = @transform_4, window_bounds = array<i64: 1, 128>}, {pipeline_mode = #tpu.pipeline_mode<synchronous>, transform_indices = @transform_5, window_bounds = array<i64: 128, 128>}, {pipeline_mode = #tpu.pipeline_mode<synchronous>, transform_indices = @transform_6, window_bounds = array<i64: 1, 128>}, {transform_indices = @transform_7, window_bounds = array<i64: 8, 128>}, {transform_indices = @transform_8, window_bounds = array<i64: 8, 128>}]} {
    %c0 = arith.constant 0 : index
    %c0_0 = arith.constant 0 : index
    %0 = vector.load %arg1[%c0, %c0_0] : memref<8x4xbf16, #tpu.memory_space<vmem>>, vector<8x4xbf16>
    %c0_1 = arith.constant 0 : index
    %c0_2 = arith.constant 0 : index
    %1 = vector.load %arg2[%c0_1, %c0_2] : memref<4x512xbf16, #tpu.memory_space<vmem>>, vector<4x512xbf16>
    %cst = arith.constant dense<0.000000e+00> : vector<8x512xf32>
    %2 = tpu.matmul %0, %1, %cst {dimension_numbers = #tpu.dot_dimension_numbers<[1], [0], [0], [1], [0, 0, 1, 1], [], []>} : vector<8x4xbf16>, vector<4x512xbf16>, vector<8x512xf32> -> vector<8x512xf32>
    %c0_3 = arith.constant 0 : index
    %c0_4 = arith.constant 0 : index
    %3 = vector.load %arg3[%c0_3, %c0_4] : memref<1x512xf32, #tpu.memory_space<vmem>>, vector<1x512xf32>
    %4 = vector.broadcast %3 : vector<1x512xf32> to vector<8x512xf32>
    %5 = arith.addf %2, %4 : vector<8x512xf32>
    %6 = arith.mulf %5, %5 : vector<8x512xf32>
    %cst_5 = arith.constant dense<0.000000e+00> : vector<8xf32>
    %7 = vector.multi_reduction <add>, %6, %cst_5 [1] : vector<8x512xf32> to vector<8xf32>
    %8 = vector.shape_cast %7 : vector<8xf32> to vector<8x1xf32>
    %cst_6 = arith.constant 1.000000e-24 : f32
    %9 = vector.broadcast %cst_6 : f32 to vector<8x1xf32>
    %10 = arith.maximumf %8, %9 : vector<8x1xf32>
    %11 = math.rsqrt %10 : vector<8x1xf32>
    %12 = vector.broadcast %11 : vector<8x1xf32> to vector<8x512xf32>
    %13 = arith.mulf %5, %12 : vector<8x512xf32>
    %c0_7 = arith.constant 0 : index
    %c0_8 = arith.constant 0 : index
    %14 = vector.load %arg4[%c0_7, %c0_8] : memref<512x128xf32, #tpu.memory_space<vmem>>, vector<512x128xf32>
    %cst_9 = arith.constant dense<0.000000e+00> : vector<8x128xf32>
    %15 = tpu.matmul %13, %14, %cst_9 {dimension_numbers = #tpu.dot_dimension_numbers<[1], [0], [0], [1], [0, 0, 1, 1], [], []>} : vector<8x512xf32>, vector<512x128xf32>, vector<8x128xf32> -> vector<8x128xf32>
    %c0_10 = arith.constant 0 : index
    %c0_11 = arith.constant 0 : index
    %16 = vector.load %arg5[%c0_10, %c0_11] : memref<1x128xf32, #tpu.memory_space<vmem>>, vector<1x128xf32>
    %17 = vector.broadcast %16 : vector<1x128xf32> to vector<8x128xf32>
    %18 = arith.addf %15, %17 : vector<8x128xf32>
    %cst_12 = arith.constant 0.000000e+00 : f32
    %19 = vector.broadcast %cst_12 : f32 to vector<8x128xf32>
    %20 = arith.maximumf %18, %19 : vector<8x128xf32>
    %c0_13 = arith.constant 0 : index
    %c0_14 = arith.constant 0 : index
    %21 = vector.load %arg8[%c0_13, %c0_14] : memref<8x128xf32, #tpu.memory_space<vmem>>, vector<8x128xf32>
    %22 = arith.mulf %20, %21 : vector<8x128xf32>
    %c0_15 = arith.constant 0 : index
    %c0_16 = arith.constant 0 : index
    %23 = vector.load %arg6[%c0_15, %c0_16] : memref<128x128xf32, #tpu.memory_space<vmem>>, vector<128x128xf32>
    %cst_17 = arith.constant dense<0.000000e+00> : vector<8x128xf32>
    %24 = tpu.matmul %22, %23, %cst_17 {dimension_numbers = #tpu.dot_dimension_numbers<[1], [0], [0], [1], [0, 0, 1, 1], [], []>} : vector<8x128xf32>, vector<128x128xf32>, vector<8x128xf32> -> vector<8x128xf32>
    %c0_18 = arith.constant 0 : index
    %c0_19 = arith.constant 0 : index
    %25 = vector.load %arg7[%c0_18, %c0_19] : memref<1x128xf32, #tpu.memory_space<vmem>>, vector<1x128xf32>
    %26 = vector.broadcast %25 : vector<1x128xf32> to vector<8x128xf32>
    %27 = arith.addf %24, %26 : vector<8x128xf32>
    %c0_20 = arith.constant 0 : index
    %c0_21 = arith.constant 0 : index
    %28 = vector.load %arg9[%c0_20, %c0_21] : memref<8x128xf32, #tpu.memory_space<vmem>>, vector<8x128xf32>
    tpu.vector_store %arg9[%c0_20, %c0_21], %27 {strides = array<i32>} : memref<8x128xf32, #tpu.memory_space<vmem>>, vector<8x128xf32>,
    return
  }
  func.func @transform_0(%arg0: i32) -> (i32, i32) {
    %c0_i32 = arith.constant 0 : i32
    %c0_i32_0 = arith.constant 0 : i32
    return %arg0, %c0_i32 : i32, i32
  }
  func.func @transform_1(%arg0: i32) -> (i32, i32) {
    %c0_i32 = arith.constant 0 : i32
    %c0_i32_0 = arith.constant 0 : i32
    %c0_i32_1 = arith.constant 0 : i32
    return %c0_i32, %c0_i32_0 : i32, i32
  }
  func.func @transform_2(%arg0: i32) -> (i32, i32) {
    %c0_i32 = arith.constant 0 : i32
    %c0_i32_0 = arith.constant 0 : i32
    %c0_i32_1 = arith.constant 0 : i32
    return %c0_i32, %c0_i32_0 : i32, i32
  }
  func.func @transform_3(%arg0: i32) -> (i32, i32) {
    %c0_i32 = arith.constant 0 : i32
    %c0_i32_0 = arith.constant 0 : i32
    %c0_i32_1 = arith.constant 0 : i32
    return %c0_i32, %c0_i32_0 : i32, i32
  }
  func.func @transform_4(%arg0: i32) -> (i32, i32) {
    %c0_i32 = arith.constant 0 : i32
    %c0_i32_0 = arith.constant 0 : i32
    %c0_i32_1 = arith.constant 0 : i32
    return %c0_i32, %c0_i32_0 : i32, i32
  }
  func.func @transform_5(%arg0: i32) -> (i32, i32) {
    %c0_i32 = arith.constant 0 : i32
    %c0_i32_0 = arith.constant 0 : i32
    %c0_i32_1 = arith.constant 0 : i32
    return %c0_i32, %c0_i32_0 : i32, i32
  }
  func.func @transform_6(%arg0: i32) -> (i32, i32) {
    %c0_i32 = arith.constant 0 : i32
    %c0_i32_0 = arith.constant 0 : i32
    %c0_i32_1 = arith.constant 0 : i32
    return %c0_i32, %c0_i32_0 : i32, i32
  }
  func.func @transform_7(%arg0: i32) -> (i32, i32) {
    %c0_i32 = arith.constant 0 : i32
    %c0_i32_0 = arith.constant 0 : i32
    return %arg0, %c0_i32 : i32, i32
  }
  func.func @transform_8(%arg0: i32) -> (i32, i32) {
    %c0_i32 = arith.constant 0 : i32
    %c0_i32_0 = arith.constant 0 : i32
    return %arg0, %c0_i32 : i32, i32
  }
}

</mosaic_0001>

<bundles_post_ra>
// kernel: tpu_custom_call.1
= control target key start
LH: loop header
LB: loop body
LE: loop exit
PB: predicated region body
PF: predicated region fallthrough
CT: control target
= control target key end

     0   :  { %13 = vsyncpa [#allocation3], 0  ;;  %s1026_s0 = inlined_call_operand.vmem [shape: bf16[8,4], index: 0, kind: input, shape index: {}]   ;;  %s1027_s1 = inlined_call_operand.vmem [shape: bf16[4,512], index: 1, kind: input, shape index: {}]   ;;  %s1028_s2 = inlined_call_operand.hbm [shape: f32[1,512], index: 2, kind: input, shape index: {}]   ;;  %s1029_s3 = inlined_call_operand.hbm [shape: f32[512,128], index: 3, kind: input, shape index: {}]   ;;  %s1030_s4 = inlined_call_operand.vmem [shape: f32[1,128], index: 4, kind: input, shape index: {}]   ;;  %s1031_s5 = inlined_call_operand.hbm [shape: f32[128,128], index: 5, kind: input, shape index: {}]   ;;  %s1032_s6 = inlined_call_operand.vmem [shape: f32[1,128], index: 6, kind: input, shape index: {}]   ;;  %s1033_s7 = inlined_call_operand.vmem [shape: f32[8,128], index: 7, kind: input, shape index: {}]   ;;  %s1034_s8 = inlined_call_operand.hbm [shape: f32[8,128], index: 8, kind: output, shape index: {}]  }
   0x1   :  { %14 = vsyncpa [#allocation6], 0 }
   0x2   :  { %15 = vsyncpa [#allocation4], 0  ;;  %s874_s27 = smov [#allocation5]   ;;  %s780_s9 = scalar_lea.hbm %s1029_s3, 8192 }
   0x3   :  { %s35_s28 = sshll.u32 %s874_s27, 4  ;;  %p781_p0 = scmp.ne.s32.totalorder %s1029_s3, %s780_s9  ;;  %s36_s28 = int_to_ptr.vmem [resolvable:$true] %s35_s28 }
   0x4   :  { %p784_p1 = scmp.lt.u32.totalorder %s780_s9, %s1029_s3 }
   0x6   :  { %p786_p2 = pnand %p784_p1, %p781_p0 }
   0x8   :  { %789 = shalt.err (!%p786_p2)
}
   0x9   :  { %s790_s14 = scalar_lea.vmem %s36_s28, 8192  ;;  %p795_p4 = scmp.lt.s32.totalorder %s36_s28, %s36_s28 }
   0xa   :  { %p791_p3 = scmp.ne.s32.totalorder %s36_s28, %s790_s14  ;;  %p796_p5 = scmp.lt.s32.totalorder %s790_s14, %s790_s14 }
   0xc   :  { %p797_p6 = por %p796_p5, %p795_p4 }
   0xe   :  { %p798_p7 = pnand %p797_p6, %p791_p3 }
  0x10   :  { %801 = shalt.err (!%p798_p7)
}
  0x11   :  { %s875_s15 = smov 128   ;;  %s876_s16 = smov 8  }
  0x12   :  { %41 = dma.hbm_to_vmem [thread:$0]  %s1029_s3, 8192, %s36_s28, [#allocation6], %s875_s15, %s875_s15, %s876_s16  }
  0x13   :  { %s877_s19 = smov [#allocation2]   ;;  %s878_s21 = smov [#allocation7]  }
  0x14   :  { %s26_s20 = sshll.u32 %s877_s19, 4  ;;  %s49_s22 = sshll.u32 %s878_s21, 4  ;;  %s27_s20 = int_to_ptr.vmem [resolvable:$true] %s26_s20  ;;  %s50_s22 = int_to_ptr.vmem [resolvable:$true] %s49_s22 }
  0x15   :  { %s802_s25 = scalar_lea.hbm %s1028_s2, 64 }
  0x16   :  { %p803_p8 = scmp.ne.s32.totalorder %s1028_s2, %s802_s25  ;;  %p806_p9 = scmp.lt.u32.totalorder %s802_s25, %s1028_s2 }
  0x18   :  { %p808_p10 = pnand %p806_p9, %p803_p8 }
  0x1a   :  { %811 = shalt.err (!%p808_p10)
}
  0x1b   :  { %s812_s3 = scalar_lea.vmem %s27_s20, 64  ;;  %p817_p12 = scmp.lt.s32.totalorder %s27_s20, %s27_s20 }
  0x1c   :  { %p813_p11 = scmp.ne.s32.totalorder %s27_s20, %s812_s3  ;;  %p818_p13 = scmp.lt.s32.totalorder %s812_s3, %s812_s3 }
  0x1e   :  { %p819_p0 = por %p818_p13, %p817_p12 }
  0x20   :  { %p820_p1 = pnand %p819_p0, %p813_p11 }
  0x22   :  { %823 = shalt.err (!%p820_p1)
}
  0x23   :  { %29 = dma.hbm_to_vmem [thread:$0]  %s1028_s2, 64, %s27_s20, [#allocation3]  }
  0x24   :  { %s824_s12 = scalar_lea.hbm %s1031_s5, 2048 }
  0x25   :  { %p825_p2 = scmp.ne.s32.totalorder %s1031_s5, %s824_s12  ;;  %p828_p3 = scmp.lt.u32.totalorder %s824_s12, %s1031_s5 }
  0x27   :  { %p830_p4 = pnand %p828_p3, %p825_p2 }
  0x29   :  { %833 = shalt.err (!%p830_p4)
}
  0x2a   :  { %s834_s19 = scalar_lea.vmem %s50_s22, 2048  ;;  %p839_p6 = scmp.lt.s32.totalorder %s50_s22, %s50_s22 }
  0x2b   :  { %p835_p5 = scmp.ne.s32.totalorder %s50_s22, %s834_s19  ;;  %p840_p7 = scmp.lt.s32.totalorder %s834_s19, %s834_s19 }
  0x2d   :  { %p841_p8 = por %p840_p7, %p839_p6 }
  0x2f   :  { %p842_p9 = pnand %p841_p8, %p835_p5 }
  0x31   :  { %845 = shalt.err (!%p842_p9)
}
  0x32   :  { %55 = dma.hbm_to_vmem [thread:$0]  %s1031_s5, 2048, %s50_s22, [#allocation6], %s875_s15, %s875_s15, %s876_s16  }
  0x33   :  { %868 = dma.done.wait [#allocation3], 64  }
  0x34   :  { %869 = vsyncadd [#allocation3], 4294967232 }
  0x35   :  { %870 = dma.done.wait [#allocation6], 10240  }
  0x36   :  { %871 = vsyncadd [#allocation6], 4294957056  ;;  %v74_v0 = vlaneseq  ;;  %v879_v1 = vmov 1983009808   ;;  %v880_v3 = vmov 0   ;;  %v71_v7 = vld [vmem:[%s1027_s1] sm:$0xff] }
  0x37   :  { %v97_v2 = vunpack.c.l.s4 %v879_v1  ;;  %161 = vmatprep.mubr.bf16.mxu1 %v880_v3  ;;  %vm116_vm0 = vcmask 1041408   ;;  %v95_v8 = vcombine.high %v71_v7, %v71_v7  ;;  %v70_v14 = vld [vmem:[%s1026_s0] sm:$0xf]  ;;  %vm112_vm1 = vcmask 31744   ;;  %v242_v16 = vld [vmem:[#allocation5 + $0x80] sm:$0xff]  ;;  %v244_v27 = vld [vmem:[#allocation5 + $0x90] sm:$0xff] }
  0x38   :  { %v972_v4 = vshrl.u32 %v74_v0, 7  ;;  %v243_v17 = vld [vmem:[#allocation5 + $0x88] sm:$0xff]  ;;  %v274_v18 = vld [vmem:[#allocation5 + $0x180] sm:$0xff]  ;;  %v245_v29 = vld [vmem:[#allocation5 + $0x98] sm:$0xff]  ;;  %vm882_vm2 = vmmov 0   ;;  %s884_s26 = smov [#allocation8]  }
  0x39   :  { %v98_v5 = vunpack.c.0.s8 %v97_v2  ;;  %v678_v19 = vpack.c.bf16 %v243_v17, %v242_v16  ;;  %v275_v20 = vld [vmem:[#allocation5 + $0x188] sm:$0xff]  ;;  %v226_v21 = vld [vmem:[#allocation5] sm:$0xff]  ;;  %v276_v30 = vld [vmem:[#allocation5 + $0x190] sm:$0xff]  ;;  %v682_v32 = vpack.c.bf16 %v245_v29, %v244_v27  ;;  %s540_s27 = sshll.u32 %s884_s26, 4  ;;  %s541_s27 = int_to_ptr.vmem [resolvable:$true] %s540_s27 }
  0x3a   :  { %v227_v22 = vld [vmem:[#allocation5 + $0x8] sm:$0xff]  ;;  %v710_v23 = vpack.c.bf16 %v275_v20, %v274_v18  ;;  %v258_v25 = vld [vmem:[#allocation5 + $0x100] sm:$0xff]  ;;  %v277_v31 = vld [vmem:[#allocation5 + $0x198] sm:$0xff]  ;;  %v76_v0 = vsub.s32 0, %v972_v4  ;;  %v80_v1 = vsub.s32 1, %v972_v4  ;;  %p851_p11 = scmp.lt.s32.totalorder %s541_s27, %s541_s27 }
  0x3b   :  { %v101_v6 = vsub.s32 %v98_v5, %v972_v4  ;;  %v680_v24 = vpack.c.bf16 %v227_v22, %v226_v21  ;;  %v259_v26 = vld [vmem:[#allocation5 + $0x108] sm:$0xff]  ;;  %679 = vmatprep.subr.bf16.mxu0 %v678_v19  ;;  %v714_v33 = vpack.c.bf16 %v277_v31, %v276_v30  ;;  %v228_v34 = vld [vmem:[#allocation5 + $0x10] sm:$0xff]  ;;  %v229_v35 = vld [vmem:[#allocation5 + $0x18] sm:$0xff] }
  0x3c   :  { %v712_v28 = vpack.c.bf16 %v259_v26, %v258_v25  ;;  %v260_v36 = vld [vmem:[#allocation5 + $0x110] sm:$0xff]  ;;  %v684_v37 = vpack.c.bf16 %v229_v35, %v228_v34  ;;  %v261_v38 = vld [vmem:[#allocation5 + $0x118] sm:$0xff]  ;;  %v246_v39 = vld [vmem:[#allocation5 + $0xa0] sm:$0xff] }
  0x3d   :  { %v102_v9 = vrot.slane %v71_v7, %v101_v6  ;;  %v109_v10 = vrot.slane %v95_v8, %v101_v6  ;;  %681 = vmatpush3.bf16.msra.mxu0 %v680_v24  ;;  %v247_v40 = vld [vmem:[#allocation5 + $0xa8] sm:$0xff]  ;;  %v716_v41 = vpack.c.bf16 %v261_v38, %v260_v36  ;;  %v278_v43 = vld [vmem:[#allocation5 + $0x1a0] sm:$0xff]  ;;  %v248_v51 = vld [vmem:[#allocation5 + $0xb0] sm:$0xff]  ;;  %v84_v8 = vsub.s32 2, %v972_v4 }
  0x3e   :  { %683 = vmatprep.subr.bf16.mxu0 %v682_v32  ;;  %v686_v42 = vpack.c.bf16 %v247_v40, %v246_v39  ;;  %v279_v44 = vld [vmem:[#allocation5 + $0x1a8] sm:$0xff]  ;;  %v230_v45 = vld [vmem:[#allocation5 + $0x20] sm:$0xff]  ;;  %v249_v52 = vld [vmem:[#allocation5 + $0xb8] sm:$0xff] }
  0x3f   :  { %v110_v11 = vcombine.high %v102_v9, %v102_v9  ;;  %v118_v12 = vsel %vm116_vm0, %v102_v9, 0  ;;  %v111_v13 = vcombine.high %v109_v10, %v109_v10  ;;  %v124_v15 = vsel %vm116_vm0, %v109_v10, 0  ;;  %v231_v47 = vld [vmem:[#allocation5 + $0x28] sm:$0xff]  ;;  %v262_v48 = vld [vmem:[#allocation5 + $0x120] sm:$0xff]  ;;  %v280_v53 = vld [vmem:[#allocation5 + $0x1b0] sm:$0xff] }
  0x40   :  { %v718_v46 = vpack.c.bf16 %v279_v44, %v278_v43  ;;  %v263_v49 = vld [vmem:[#allocation5 + $0x128] sm:$0xff]  ;;  %v688_v50 = vpack.c.bf16 %v231_v47, %v230_v45  ;;  %v690_v55 = vpack.c.bf16 %v249_v52, %v248_v51  ;;  %v281_v56 = vld [vmem:[#allocation5 + $0x1b8] sm:$0xff]  ;;  %v232_v57 = vld [vmem:[#allocation5 + $0x30] sm:$0xff]  ;;  %v88_v10 = vsub.s32 3, %v972_v4 }
  0x41   :  { %550 = vmatprep.subr.msk.bf16.mxu1 %vm116_vm0, %v110_v11  ;;  %685 = vmatpush3.bf16.msra.mxu0 %v684_v37  ;;  %v720_v54 = vpack.c.bf16 %v263_v49, %v262_v48  ;;  %v233_v58 = vld [vmem:[#allocation5 + $0x38] sm:$0xff]  ;;  %v722_v59 = vpack.c.bf16 %v281_v56, %v280_v53  ;;  %v264_v60 = vld [vmem:[#allocation5 + $0x130] sm:$0xff]  ;;  %v251_v29 = vld [vmem:[#allocation5 + $0xc8] sm:$0xff] }
  0x42   :  { %130 = vmatpush1.bf16.msra.mxu1 %v118_v12  ;;  %687 = vmatprep.subr.bf16.mxu0 %v686_v42  ;;  %v265_v61 = vld [vmem:[#allocation5 + $0x138] sm:$0xff]  ;;  %v692_v62 = vpack.c.bf16 %v233_v58, %v232_v57  ;;  %v282_v30 = vld [vmem:[#allocation5 + $0x1c0] sm:$0xff]  ;;  %v283_v32 = vld [vmem:[#allocation5 + $0x1c8] sm:$0xff] }
  0x43   :  { %552 = vmatprep.subr.msk.bf16.mxu1 %vm116_vm0, %v111_v13  ;;  %v724_v63 = vpack.c.bf16 %v265_v61, %v264_v60  ;;  %v72_v2 = vld [vmem:[#allocation2] sm:$0xf]  ;;  %v235_v34 = vld [vmem:[#allocation5 + $0x48] sm:$0xff]  ;;  %v726_v35 = vpack.c.bf16 %v283_v32, %v282_v30  ;;  %v266_v37 = vld [vmem:[#allocation5 + $0x140] sm:$0xff] }
  0x44   :  { %v81_v5 = vrot.slane %v72_v2, %v80_v1  ;;  %v267_v38 = vld [vmem:[#allocation5 + $0x148] sm:$0xff]  ;;  %v252_v40 = vld [vmem:[#allocation5 + $0xd0] sm:$0xff]  ;;  %v285_v44 = vld [vmem:[#allocation5 + $0x1d8] sm:$0xff] }
  0x45   :  { %551 = vmatmul.mubr.msk.bf16.vlgmr.msra.gmra.mrb[0].mxu1 %vm112_vm1, %v70_v14  ;;  %689 = vmatpush3.bf16.msra.mxu0 %v688_v50  ;;  %v728_v39 = vpack.c.bf16 %v267_v38, %v266_v37  ;;  %v284_v42 = vld [vmem:[#allocation5 + $0x1d0] sm:$0xff]  ;;  %v269_v50 = vld [vmem:[#allocation5 + $0x158] sm:$0xff]  ;;  %v254_v51 = vld [vmem:[#allocation5 + $0xe0] sm:$0xff] }
  0x46   :  { %171 = vmatpush1.bf16.msra.mxu1 %v124_v15  ;;  %202 = vmatprep.mubr.bf16.mxu1 %v880_v3  ;;  %v77_v3 = vrot.slane %v72_v2, %v76_v0  ;;  %v89_v15 = vrot.slane %v72_v2, %v88_v10  ;;  %v236_v45 = vld [vmem:[#allocation5 + $0x50] sm:$0xff]  ;;  %v730_v47 = vpack.c.bf16 %v285_v44, %v284_v42  ;;  %v255_v53 = vld [vmem:[#allocation5 + $0xe8] sm:$0xff]  ;;  %v238_v58 = vld [vmem:[#allocation5 + $0x60] sm:$0xff]  ;;  %v883_v44 = vmov 0.0  }
  0x47   :  { %711 = vmatprep.subr.bf16.mxu1 %v710_v23  ;;  %691 = vmatprep.subr.bf16.mxu0 %v690_v55  ;;  %v268_v49 = vld [vmem:[#allocation5 + $0x150] sm:$0xff]  ;;  %v287_v55 = vld [vmem:[#allocation5 + $0x1e8] sm:$0xff]  ;;  %v702_v56 = vpack.c.bf16 %v255_v53, %v254_v51  ;;  %v270_v60 = vld [vmem:[#allocation5 + $0x160] sm:$0xff] }
  0x48   :  { %v732_v52 = vpack.c.bf16 %v269_v50, %v268_v49  ;;  %v257_v0 = vld [vmem:[#allocation5 + $0xf8] sm:$0xff]  ;;  %v444_v30 = vld [vmem:[#allocation7 + $0x20] sm:$0xff] }
  0x49   :  { %693 = vmatpush3.bf16.msra.mxu0 %v692_v62  ;;  %v271_v62 = vld [vmem:[#allocation5 + $0x168] sm:$0xff]  ;;  %v273_v10 = vld [vmem:[#allocation5 + $0x178] sm:$0xff]  ;;  %v452_v38 = vld [vmem:[#allocation7 + $0x60] sm:$0xff] }
  0x4a   :  { %v736_v1 = vpack.c.bf16 %v271_v62, %v270_v60  ;;  %v455_v42 = vld [vmem:[#allocation7 + $0x78] sm:$0xff] }
  0x4d   :  { %553 = vmatmul.mubr.msk.bf16.vlgmr.msra.gmra.mrb[4].mxu1 %vm112_vm1, %v70_v14  ;;  %v85_v14 = vrot.slane %v72_v2, %v84_v8  ;;  %v241_v8 = vld [vmem:[#allocation5 + $0x78] sm:$0xff] }
  0x4e   :  { %713 = vmatpush3.bf16.msra.mxu1 %v712_v28  ;;  %v250_v28 = vld [vmem:[#allocation5 + $0xc0] sm:$0xff] }
  0x4f   :  { %715 = vmatprep.subr.bf16.mxu1 %v714_v33  ;;  %v694_v31 = vpack.c.bf16 %v251_v29, %v250_v28  ;;  %v234_v33 = vld [vmem:[#allocation5 + $0x40] sm:$0xff]  ;;  %v443_v28 = vld [vmem:[#allocation7 + $0x18] sm:$0xff] }
  0x50   :  { %v696_v36 = vpack.c.bf16 %v235_v34, %v234_v33  ;;  %v449_v33 = vld [vmem:[#allocation7 + $0x48] sm:$0xff] }
  0x51   :  { %695 = vmatprep.subr.bf16.mxu0 %v694_v31  ;;  %v445_v31 = vld [vmem:[#allocation7 + $0x28] sm:$0xff] }
  0x52   :  { %717 = vmatpush3.bf16.msra.mxu1 %v716_v41  ;;  %697 = vmatpush3.bf16.msra.mxu0 %v696_v36  ;;  %v253_v41 = vld [vmem:[#allocation5 + $0xd8] sm:$0xff]  ;;  %v749_v32 = vpack.c.bf16 %v445_v31, %v444_v30 }
  0x53   :  { %719 = vmatprep.subr.bf16.mxu1 %v718_v46  ;;  %v698_v43 = vpack.c.bf16 %v253_v41, %v252_v40  ;;  %v237_v46 = vld [vmem:[#allocation5 + $0x58] sm:$0xff]  ;;  %v454_v41 = vld [vmem:[#allocation7 + $0x70] sm:$0xff] }
  0x54   :  { %v700_v48 = vpack.c.bf16 %v237_v46, %v236_v45  ;;  %v451_v36 = vld [vmem:[#allocation7 + $0x58] sm:$0xff] }
  0x55   :  { %699 = vmatprep.subr.bf16.mxu0 %v698_v43  ;;  %v764_v43 = vpack.c.bf16 %v455_v42, %v454_v41 }
  0x56   :  { %721 = vmatpush3.bf16.msra.mxu1 %v720_v54  ;;  %v286_v54 = vld [vmem:[#allocation5 + $0x1e0] sm:$0xff]  ;;  %701 = vmatpush3.bf16.msra.mxu0 %v700_v48 }
  0x57   :  { %723 = vmatprep.subr.bf16.mxu1 %v722_v59  ;;  %v734_v57 = vpack.c.bf16 %v287_v55, %v286_v54  ;;  %v239_v59 = vld [vmem:[#allocation5 + $0x68] sm:$0xff]  ;;  %703 = vmatprep.subr.bf16.mxu0 %v702_v56 }
  0x58   :  { %v704_v61 = vpack.c.bf16 %v239_v59, %v238_v58  ;;  %v438_v54 = vld [vmem:[%s1033_s7] sm:$0xff] }
  0x5a   :  { %725 = vmatpush3.bf16.msra.mxu1 %v724_v63  ;;  %v256_v63 = vld [vmem:[#allocation5 + $0xf0] sm:$0xff]  ;;  %705 = vmatpush3.bf16.msra.mxu0 %v704_v61 }
  0x5b   :  { %727 = vmatprep.subr.bf16.mxu1 %v726_v35  ;;  %v706_v2 = vpack.c.bf16 %v257_v0, %v256_v63  ;;  %v450_v35 = vld [vmem:[#allocation7 + $0x50] sm:$0xff] }
  0x5c   :  { %v758_v37 = vpack.c.bf16 %v451_v36, %v450_v35 }
  0x5d   :  { %707 = vmatprep.subr.bf16.mxu0 %v706_v2 }
  0x5e   :  { %729 = vmatpush3.bf16.msra.mxu1 %v728_v39  ;;  %v453_v39 = vld [vmem:[#allocation7 + $0x68] sm:$0xff] }
  0x5f   :  { %731 = vmatprep.subr.bf16.mxu1 %v730_v47  ;;  %v761_v40 = vpack.c.bf16 %v453_v39, %v452_v38  ;;  %v554_v47 = vld [vmem:[%s1030_s4] ss:$0 sm:$0xff]  ;;  %s846_s4 = scalar_lea.vmem %s541_s27, 128 }
  0x60   :  { %p847_p10 = scmp.ne.s32.totalorder %s541_s27, %s846_s4  ;;  %p852_p12 = scmp.lt.s32.totalorder %s846_s4, %s846_s4 }
  0x62   :  { %733 = vmatpush3.bf16.msra.mxu1 %v732_v52  ;;  %p853_p13 = por %p852_p12, %p851_p11 }
  0x63   :  { %735 = vmatprep.subr.bf16.mxu1 %v734_v57  ;;  %v555_v57 = vld [vmem:[%s1032_s6] ss:$0 sm:$0xff] }
  0x64   :  { %p854_p0 = pnand %p853_p13, %p847_p10 }
  0x66   :  { %737 = vmatpush3.bf16.msra.mxu1 %v736_v1 }
 0x118   :  { %v163_v6 = vpop.f32.mrb[0].mxu1 }
 0x119   :  { %v165_v7 = vpop.f32.mrb[1].mxu1  ;;  %v985_v11 = vadd.f32 %v163_v6, %v77_v3  ;;  %v288_v3 = vld [vmem:[#allocation5 + $0x1f0] sm:$0xff] }
 0x11a   :  { %v167_v9 = vpop.f32.mrb[2].mxu1  ;;  %v987_v12 = vadd.f32 %v165_v7, %v81_v5  ;;  %v289_v5 = vld [vmem:[#allocation5 + $0x1f8] sm:$0xff]  ;;  %v240_v6 = vld [vmem:[#allocation5 + $0x70] sm:$0xff] }
 0x11b   :  { %v168_v13 = vpop.f32.mrb[3].mxu1  ;;  %v211_v16 = vmul.f32 %v985_v11, %v985_v11  ;;  %v738_v7 = vpack.c.bf16 %v289_v5, %v288_v3  ;;  %v272_v9 = vld [vmem:[#allocation5 + $0x170] sm:$0xff] }
 0x11c   :  { %v212_v17 = vmul.f32 %v987_v12, %v987_v12  ;;  %v708_v13 = vpack.c.bf16 %v241_v8, %v240_v6 }
 0x11d   :  { %739 = vmatprep.subr.bf16.mxu1 %v738_v7 }
 0x11e   :  { %v215_v24 = vadd.f32 %v212_v17, %v211_v16  ;;  %709 = vmatpush3.bf16.msra.mxu0 %v708_v13 }
 0x120   :  { %v204_v18 = vpop.f32.mrb[4].mxu1 }
 0x121   :  { %v993_v19 = vadd.f32 %v204_v18, %v85_v14  ;;  %v206_v20 = vpop.f32.mrb[5].mxu1  ;;  %v740_v14 = vpack.c.bf16 %v273_v10, %v272_v9  ;;  %v440_v18 = vld [vmem:[#allocation7] sm:$0xff] }
 0x122   :  { %v995_v21 = vadd.f32 %v206_v20, %v89_v15  ;;  %v208_v4 = vpop.f32.mrb[6].mxu1  ;;  %v881_v15 = vmov 0.0|0.0   ;;  %v441_v20 = vld [vmem:[#allocation7 + $0x8] sm:$0xff] }
 0x123   :  { %v213_v22 = vmul.f32 %v993_v19, %v993_v19  ;;  %v209_v23 = vpop.f32.mrb[7].mxu1  ;;  %741 = vmatpush3.bf16.msra.mxu1 %v740_v14  ;;  %742 = vmatprep.subr.bf16.mxu0 %v881_v15 }
 0x124   :  { %v214_v25 = vmul.f32 %v995_v21, %v995_v21 }
 0x125   :  { %v216_v26 = vadd.f32 %v215_v24, %v213_v22  ;;  %v743_v22 = vpack.c.bf16 %v441_v20, %v440_v18 }
 0x127   :  { %v217_v27 = vadd.f32 %v216_v26, %v214_v25 }
 0x129   :  { %218 = vadd.xlane.f32.xlu0 %v217_v27  ;;  %v442_v27 = vld [vmem:[#allocation7 + $0x10] sm:$0xff] }
 0x12a   :  { %v746_v29 = vpack.c.bf16 %v443_v28, %v442_v27 }
 0x1b6   :  { %v219_v16 = vpop.xlane.xlu0 %218 }
 0x1b7   :  { %v220_v17 = vmax.f32 %v219_v16, 1e-24 }
 0x1b9   :  { %778 = vrsqrt.f32 %v220_v17 }
 0x1c3   :  { %v779_v4 = vpop.eup %778 }
 0x1c4   :  { %v223_v23 = vmul.f32 %v779_v4, %v987_v12  ;;  %v225_v24 = vmul.f32 %v779_v4, %v995_v21  ;;  %v222_v25 = vmul.f32 %v779_v4, %v985_v11  ;;  %v224_v26 = vmul.f32 %v779_v4, %v993_v19  ;;  %v446_v12 = vld [vmem:[#allocation7 + $0x30] sm:$0xff]  ;;  %v447_v21 = vld [vmem:[#allocation7 + $0x38] sm:$0xff]  ;;  %v448_v19 = vld [vmem:[#allocation7 + $0x40] sm:$0xff] }
 0x1c5   :  { %v752_v11 = vpack.c.bf16 %v447_v21, %v446_v12  ;;  %v755_v34 = vpack.c.bf16 %v449_v33, %v448_v19 }
 0x1c6   :  { %361 = vmatprep.mubr.f32.mxu0 %v223_v23  ;;  %431 = vmatprep.mubr.f32.mxu1 %v225_v24 }
 0x1c7   :  { %362 = vmatmul.mubr.f32.vlgmr.msra.gmra.mrb[0].mxu0 %v222_v25  ;;  %432 = vmatmul.mubr.f32.vlgmr.msra.gmra.mrb[8].mxu1 %v224_v26 }
 0x1c8   :  { %744 = vmatpush3.bf16.msra.mxu0 %v743_v22  ;;  %675 = vmatprep.mubr.msk.f32.mxu0 %vm882_vm2, %v883_v44 }
 0x1c9   :  { %745 = vmatprep.subr.bf16.mxu0 %v881_v15 }
 0x1cc   :  { %747 = vmatpush3.bf16.msra.mxu0 %v746_v29 }
 0x1cd   :  { %748 = vmatprep.subr.bf16.mxu0 %v881_v15 }
 0x1d0   :  { %750 = vmatpush3.bf16.msra.mxu0 %v749_v32 }
 0x1d1   :  { %751 = vmatprep.subr.bf16.mxu0 %v881_v15 }
 0x1d4   :  { %753 = vmatpush3.bf16.msra.mxu0 %v752_v11 }
 0x1d5   :  { %754 = vmatprep.subr.bf16.mxu0 %v881_v15 }
 0x1d8   :  { %756 = vmatpush3.bf16.msra.mxu0 %v755_v34 }
 0x1d9   :  { %757 = vmatprep.subr.bf16.mxu0 %v881_v15 }
 0x1dc   :  { %759 = vmatpush3.bf16.msra.mxu0 %v758_v37 }
 0x1dd   :  { %760 = vmatprep.subr.bf16.mxu0 %v881_v15 }
 0x1e0   :  { %762 = vmatpush3.bf16.msra.mxu0 %v761_v40 }
 0x1e1   :  { %763 = vmatprep.subr.bf16.mxu0 %v881_v15 }
 0x1e4   :  { %765 = vmatpush3.bf16.msra.mxu0 %v764_v43 }
 0x29a   :  { %v588_v45 = vpop.f32.mrb[0].mxu0  ;;  %v623_v46 = vpop.f32.mrb[8].mxu1 }
 0x29b   :  { %v589_v48 = vpop.f32.mrb[1].mxu0  ;;  %v624_v49 = vpop.f32.mrb[9].mxu1 }
 0x29c   :  { %v590_v50 = vadd.f32 %v589_v48, %v588_v45  ;;  %v625_v51 = vadd.f32 %v624_v49, %v623_v46 }
 0x29e   :  { %v364_v52 = vadd.f32 %v590_v50, %v554_v47 }
 0x2a0   :  { %v434_v53 = vadd.f32 %v625_v51, %v364_v52 }
 0x2a2   :  { %v437_v55 = vmax.f32 %v434_v53, 0.0 }
 0x2a4   :  { %v439_v56 = vmul.f32 %v438_v54, %v437_v55 }
 0x2a6   :  { %676 = vmatmul.mubr.f32.vlgmr.msra.gmra.mrb[2].mxu0 %v439_v56 }
 0x379   :  { %v529_v58 = vpop.f32.mrb[2].mxu0 }
 0x37a   :  { %v530_v59 = vadd.f32 %v555_v57, %v529_v58  ;;  %v677_v60 = vpop.f32.mrb[3].mxu0 }
 0x37c   :  { %533 = vst [vmem:[#allocation8] sm:$0xff] %v530_v59 }
 0x37d   :  { %857 = shalt.err (!%p854_p0)
}
 0x37e   :  { %s858_s30 = scalar_lea.hbm %s1034_s8, 128 }
 0x37f   :  { %p859_p1 = scmp.ne.s32.totalorder %s1034_s8, %s858_s30  ;;  %p862_p2 = scmp.lt.u32.totalorder %s858_s30, %s1034_s8 }
 0x381   :  { %p864_p3 = pnand %p862_p2, %p859_p1 }
 0x383   :  { %867 = shalt.err (!%p864_p3)
}
 0x384   :  { %543 = dma.vmem_to_hbm [thread:$0]  %s541_s27, 128, %s1034_s8, [#allocation4]  }
 0x385   :  { %872 = dma.done.wait [#allocation4], 128  }
 0x386   :  { %873 = vsyncadd [#allocation4], 4294967168 }
 0x387   :  { %547 = vsyncpa [#allocation3], 1 }
 0x388   :  { %548 = vsyncpa [#allocation6], 1 }
 0x389   :  { %549 = vsyncpa [#allocation4], 1 }

</bundles_post_ra>
